<compile_context>
chip_gen: v7x
topology: tpu7x:2x2x1
jax: 0.10.0
libtpu: 0.0.40
codegen_flags: <defaults>
</compile_context>

<pallas_src>
import jax
import jax.numpy as jnp
from jax.experimental import pallas as pl
from jax.experimental.pallas import tpu as pltpu

_MIB = 1024 * 1024


def _round_up(x, m):
    return ((x + m - 1) // m) * m


def _vmem_params():
    """Generation-aware (double-buffer budget, vmem_limit_bytes)."""
    try:
        cap = int(pltpu.get_tpu_info().vmem_capacity_bytes)
    except Exception:
        cap = 64 * _MIB  # be conservative if the query is unavailable
    if cap <= 64 * _MIB:              # v7x-class: 64 MiB per TensorCore
        return 24 * _MIB, 40 * _MIB
    return 48 * _MIB, 80 * _MIB       # v5e / v6e: 128 MiB VMEM


def _patch_embed_kernel(x_ref, w_ref, b_ref, o_ref):
    # x_ref: (tm, K), w_ref: (K, tn), b_ref: (1, tn) f32, o_ref: (tm, tn)
    acc = jnp.dot(x_ref[...], w_ref[...], preferred_element_type=jnp.float32)
    o_ref[...] = (acc + b_ref[...]).astype(o_ref.dtype)


def _choose_tn(e, cap=1024):
    """E-tile: whole E if small, else largest 128-multiple divisor <= cap."""
    if e <= cap:
        return e
    best = 0
    t = 128
    while t <= cap:
        if e % t == 0:
            best = t
        t += 128
    return best if best else e


def _choose_tm(m, k, tn, *, row_align, in_itemsize, out_itemsize, budget,
               cap=4096):
    """Largest M tile (multiple of row_align, preferring exact divisors of M)
    whose double-buffered patches/weight/bias/output tiles fit the budget."""
    cap = max(row_align, min(cap, _round_up(m, row_align)))

    def footprint(tm):
        return ((2 * tm * k + 2 * k * tn) * in_itemsize
                + 2 * tn * 4
                + 2 * tm * tn * out_itemsize)

    # Prefer an exact divisor of M: no row padding, no post-kernel slice.
    best_div = 0
    d = row_align
    while d <= min(cap, m):
        if m % d == 0 and footprint(d) <= budget:
            best_div = d
        d += row_align
    if best_div:
        tm = best_div
    else:
        tm = cap
        while tm > row_align and footprint(tm) > budget:
            tm = max(row_align, tm // 2)

    # Keep >= 2 grid steps along M so the v7x megacore can shard the axis
    # across both TensorCores (harmless on single-TC v5e/v6e).
    if m > 2 * row_align and pl.cdiv(m, tm) < 2:
        half = _round_up(pl.cdiv(m, 2), row_align)
        d2 = half
        while d2 >= row_align:
            if m % d2 == 0:
                half = d2
                break
            d2 -= row_align
        tm = half
    return tm


def _projection(patches, weight, bias, *, tm, tn, out_dtype, vmem_limit):
    """patches: (M_pad, K), weight: (K, E_eff), bias: (1, E_eff) -> (M_pad, E_eff)."""
    m, k = patches.shape
    _, e = weight.shape
    grid_m = m // tm
    grid_n = pl.cdiv(e, tn)
    # Grid ordered (n, m): the weight block index only changes when the
    # (usually singleton) n axis steps, so the weight is DMA'd from HBM once
    # and stays resident across all M tiles.
    grid = (grid_n, grid_m)

    in_isz = patches.dtype.itemsize
    out_isz = jnp.dtype(out_dtype).itemsize
    flops = 2 * m * k * e
    bytes_accessed = int(
        grid_n * m * k * in_isz              # patches, re-read once per n step
        + k * e * weight.dtype.itemsize      # weight, resident across m steps
        + e * bias.dtype.itemsize
        + m * e * out_isz                    # (padded) output actually written
    )

    return pl.pallas_call(
        _patch_embed_kernel,
        out_shape=jax.ShapeDtypeStruct((m, e), out_dtype),
        grid_spec=pltpu.PrefetchScalarGridSpec(
            num_scalar_prefetch=0,
            grid=grid,
            in_specs=[
                pl.BlockSpec((tm, k), lambda j, i: (i, 0)),   # patches
                pl.BlockSpec((k, tn), lambda j, i: (0, j)),   # weight
                pl.BlockSpec((1, tn), lambda j, i: (0, j)),   # bias (f32)
            ],
            out_specs=pl.BlockSpec((tm, tn), lambda j, i: (i, j)),
        ),
        compiler_params=pltpu.CompilerParams(
            dimension_semantics=("parallel", "parallel"),
            vmem_limit_bytes=vmem_limit,
        ),
        cost_estimate=pl.CostEstimate(
            flops=flops, transcendentals=0, bytes_accessed=bytes_accessed),
    )(patches, weight, bias)


class PatchEmbed:
    """JAX/Pallas port of the PyTorch PatchEmbed module (forward only).

    `compute_dtype=jnp.bfloat16` halves the dominant HBM streams and is a win
    on every generation (v5e included: its MXU takes bf16 natively and it has
    the lowest HBM bandwidth); accumulation stays f32 in-kernel.  `out_dtype`
    lets the output stream follow suit.
    """

    def __init__(self, img_size=256, patch_size=16, in_chans=3, embed_dim=768,
                 *, key=None, param_dtype=jnp.float32, compute_dtype=None,
                 out_dtype=None):
        self.img_size = (img_size, img_size)
        self.patch_size = (patch_size, patch_size)
        self.num_patches = (img_size // patch_size) * (img_size // patch_size)
        self.in_chans = in_chans
        self.embed_dim = embed_dim
        self.compute_dtype = compute_dtype
        self.out_dtype = out_dtype

        if key is None:
            key = jax.random.PRNGKey(0)
        k_w, k_b = jax.random.split(key)
        # Deterministic synthetic init (same shapes as nn.Conv2d weights).
        fan_in = in_chans * patch_size * patch_size
        bound = 1.0 / (fan_in ** 0.5)
        self.conv_w = jax.random.uniform(
            k_w, (embed_dim, in_chans, patch_size, patch_size),
            minval=-bound, maxval=bound, dtype=param_dtype)
        self.conv_b = jax.random.uniform(
            k_b, (embed_dim,), minval=-bound, maxval=bound, dtype=param_dtype)

        # Lane-dense output padding only when it adds <= 12.5% output bytes.
        # For small embed dims (e.g. 32/64) the 2-4x extra HBM writes outweigh
        # the masked-store penalty in this memory-bound kernel.
        e_pad = _round_up(embed_dim, 128)
        self.e_eff = e_pad if (e_pad - embed_dim) * 8 <= embed_dim else embed_dim

        w2d = self.conv_w.reshape(embed_dim, fan_in).T        # (K, E)
        b1d = self.conv_b                                      # (E,)
        if self.e_eff != embed_dim:
            w2d = jnp.pad(w2d, ((0, 0), (0, self.e_eff - embed_dim)))
            b1d = jnp.pad(b1d, (0, self.e_eff - embed_dim))
        gemm_dtype = compute_dtype if compute_dtype is not None else param_dtype
        self.w_gemm = w2d.astype(gemm_dtype)                   # (K, E_eff)
        self.b_gemm = b1d.reshape(1, self.e_eff).astype(jnp.float32)

    def __call__(self, x):
        # x: NCHW, (B, C, H, W)
        B, C, H, W = x.shape
        assert H == self.img_size[0] and W == self.img_size[1], (
            f"Input image size ({H}*{W}) doesn't match model "
            f"({self.img_size[0]}*{self.img_size[1]}).")
        ph, pw = self.patch_size
        gh, gw = H // ph, W // pw
        K = C * ph * pw
        M = B * gh * gw

        compute_dtype = self.compute_dtype
        out_dtype = self.out_dtype if self.out_dtype is not None else (
            compute_dtype if compute_dtype is not None else x.dtype)

        # Patch extraction in the wrapper: XLA fuses the 6-D transpose and the
        # optional bf16 cast into one pass over x (cast after transpose so it
        # is a single fusion producing the narrow dtype).
        patches = x.reshape(B, C, gh, ph, gw, pw)
        patches = patches.transpose(0, 2, 4, 1, 3, 5).reshape(M, K)
        if compute_dtype is not None:
            patches = patches.astype(compute_dtype)

        budget, vmem_limit = _vmem_params()
        in_isz = patches.dtype.itemsize
        out_isz = jnp.dtype(out_dtype).itemsize
        # Sublane packing: bf16 packs 2 rows/sublane -> align tm to 16.
        row_align = 8 if in_isz >= 4 else (16 if in_isz == 2 else 32)

        tn = _choose_tn(self.e_eff)
        tm = _choose_tm(M, K, tn, row_align=row_align, in_itemsize=in_isz,
                        out_itemsize=out_isz, budget=budget)
        m_pad = _round_up(M, tm)
        if m_pad != M:
            patches = jnp.pad(patches, ((0, m_pad - M), (0, 0)))

        out2d = _projection(patches, self.w_gemm, self.b_gemm,
                            tm=tm, tn=tn, out_dtype=out_dtype,
                            vmem_limit=vmem_limit)                # (M_pad, E_eff)
        if m_pad != M:
            out2d = out2d[:M]
        if self.e_eff != self.embed_dim:
            out2d = out2d[:, :self.embed_dim]
        return out2d.reshape(B, gh * gw, self.embed_dim)          # (B, N, E)


def _reference(x, conv_w, conv_b, patch_size):
    """Plain-JAX reference of the PyTorch forward for verification."""
    out = jax.lax.conv_general_dilated(
        x, conv_w,
        window_strides=(patch_size, patch_size),
        padding="VALID",
        dimension_numbers=("NCHW", "OIHW", "NCHW"),
    ) + conv_b[None, :, None, None]
    B, E, Hp, Wp = out.shape
    return out.reshape(B, E, Hp * Wp).transpose(0, 2, 1)  # (B, N, E)


if __name__ == "__main__":
    key = jax.random.PRNGKey(0)
    k_x, k_params = jax.random.split(key)

    B, C, H, W = 2, 4, 16, 16
    patch_size = 4
    embed_dim = 32
    N = (H // patch_size) * (W // patch_size)

    x = jax.random.normal(k_x, (B, C, H, W), dtype=jnp.float32)

    # f32 path (checked tight against the conv reference).
    mod = PatchEmbed(img_size=H, patch_size=patch_size, in_chans=C,
                     embed_dim=embed_dim, key=k_params)
    out = jax.block_until_ready(mod(x))
    ref = _reference(x, mod.conv_w, mod.conv_b, patch_size)
    assert out.shape == (B, N, embed_dim)
    assert jnp.allclose(out, ref, atol=1e-4, rtol=1e-4), "f32 mismatch vs reference"

    # bf16 operand + bf16 output path (fast path on v5e/v6e/v7x), f32 accum.
    mod_bf16 = PatchEmbed(img_size=H, patch_size=patch_size, in_chans=C,
                          embed_dim=embed_dim, key=k_params,
                          compute_dtype=jnp.bfloat16, out_dtype=jnp.bfloat16)
    out_bf16 = jax.block_until_ready(mod_bf16(x))
    assert out_bf16.shape == (B, N, embed_dim)
    assert out_bf16.dtype == jnp.bfloat16
    assert jnp.allclose(out_bf16.astype(jnp.float32), ref,
                        atol=5e-2, rtol=5e-2), "bf16 mismatch vs reference"

    print("KERNEL_OK")
</pallas_src>

<mosaic_0001>
module attributes {stable_mosaic.version = 11 : i64} {
  func.func @_patch_embed_kernel(%arg0: i32, %arg1: i32, %arg2: memref<16x64xf32, #tpu.memory_space<vmem>>, %arg3: memref<64x32xf32, #tpu.memory_space<vmem>>, %arg4: memref<1x32xf32, #tpu.memory_space<vmem>>, %arg5: memref<16x32xf32, #tpu.memory_space<vmem>>) attributes {dimension_semantics = [#tpu.dimension_semantics<parallel>, #tpu.dimension_semantics<parallel>], iteration_bounds = array<i64: 1, 2>, scalar_prefetch = 0 : i64, scratch_operands = 0 : i64, tpu.core_type = #tpu.core_type<tc>, window_params = [{transform_indices = @transform_0, window_bounds = array<i64: 16, 64>}, {transform_indices = @transform_1, window_bounds = array<i64: 64, 32>}, {transform_indices = @transform_2, window_bounds = array<i64: 1, 32>}, {transform_indices = @transform_3, window_bounds = array<i64: 16, 32>}]} {
    %c0 = arith.constant 0 : index
    %c0_0 = arith.constant 0 : index
    %0 = vector.load %arg2[%c0, %c0_0] : memref<16x64xf32, #tpu.memory_space<vmem>>, vector<16x64xf32>
    %c0_1 = arith.constant 0 : index
    %c0_2 = arith.constant 0 : index
    %1 = vector.load %arg3[%c0_1, %c0_2] : memref<64x32xf32, #tpu.memory_space<vmem>>, vector<64x32xf32>
    %cst = arith.constant dense<0.000000e+00> : vector<16x32xf32>
    %2 = tpu.matmul %0, %1, %cst {dimension_numbers = #tpu.dot_dimension_numbers<[1], [0], [0], [1], [0, 0, 1, 1], [], []>} : vector<16x64xf32>, vector<64x32xf32>, vector<16x32xf32> -> vector<16x32xf32>
    %c0_3 = arith.constant 0 : index
    %c0_4 = arith.constant 0 : index
    %3 = vector.load %arg4[%c0_3, %c0_4] : memref<1x32xf32, #tpu.memory_space<vmem>>, vector<1x32xf32>
    %4 = vector.broadcast %3 : vector<1x32xf32> to vector<16x32xf32>
    %5 = arith.addf %2, %4 : vector<16x32xf32>
    %c0_5 = arith.constant 0 : index
    %c0_6 = arith.constant 0 : index
    %6 = vector.load %arg5[%c0_5, %c0_6] : memref<16x32xf32, #tpu.memory_space<vmem>>, vector<16x32xf32>
    tpu.vector_store %arg5[%c0_5, %c0_6], %5 {strides = array<i32>} : memref<16x32xf32, #tpu.memory_space<vmem>>, vector<16x32xf32>,
    return
  }
  func.func @transform_0(%arg0: i32, %arg1: i32) -> (i32, i32) {
    %c0_i32 = arith.constant 0 : i32
    %c0_i32_0 = arith.constant 0 : i32
    return %arg1, %c0_i32 : i32, i32
  }
  func.func @transform_1(%arg0: i32, %arg1: i32) -> (i32, i32) {
    %c0_i32 = arith.constant 0 : i32
    %c0_i32_0 = arith.constant 0 : i32
    return %c0_i32, %arg0 : i32, i32
  }
  func.func @transform_2(%arg0: i32, %arg1: i32) -> (i32, i32) {
    %c0_i32 = arith.constant 0 : i32
    %c0_i32_0 = arith.constant 0 : i32
    return %c0_i32, %arg0 : i32, i32
  }
  func.func @transform_3(%arg0: i32, %arg1: i32) -> (i32, i32) {
    %c0_i32 = arith.constant 0 : i32
    return %arg1, %arg0 : i32, i32
  }
}

</mosaic_0001>

<bundles_post_ra>
// kernel: tpu_custom_call.1
= control target key start
LH: loop header
LB: loop body
LE: loop exit
PB: predicated region body
PF: predicated region fallthrough
CT: control target
= control target key end

     0   :  { %8 = vsyncpa [#allocation3], 0  ;;  %s798_s0 = inlined_call_operand.vmem [shape: f32[32,64], index: 0, kind: input, shape index: {}]   ;;  %s799_s1 = inlined_call_operand.vmem [shape: f32[64,32], index: 1, kind: input, shape index: {}]   ;;  %s800_s2 = inlined_call_operand.vmem [shape: f32[1,32], index: 2, kind: input, shape index: {}]   ;;  %s801_s3 = inlined_call_operand.hbm [shape: f32[32,32], index: 3, kind: output, shape index: {}]  }
   0x1   :  { %10 = vsyncpa [#allocation3 + $0x1], 0  ;;  %s657_s12 = smov 0   ;;  %s659_s13 = smov 0  }
   0x2   :  { %s661_s14 = smov 0   ;;  %s663_s15 = smov 0  }
   0x3   :  { %s665_s16 = smov 0   ;;  %s667_s17 = smov 0  }
   0x4 LB: > { %s433_s18 = sadd.s32 4294967295, %s632_s17   ;;  %s434_s19 = sadd.s32 4294967294, %s632_s17   ;;  %s632_s17 = sphi %s667_s17, %s16_s17   ;;  %s628_s16 = sphi %s665_s16, %s808_s16   ;;  %s624_s15 = sphi %s663_s15, %s807_s15   ;;  %s620_s14 = sphi %s661_s14, %s806_s14   ;;  %s616_s13 = sphi %s659_s13, %s805_s13   ;;  %s612_s12 = sphi %s657_s12, %s804_s12  }
   0x5   : > { %s25_s20 = sadd.s32 1, %s628_s16  ;;  %s115_s21 = sadd.s32 1, %s620_s14 }
   0x6   : > { %p26_p0 = scmp.ge.s32.totalorder %s25_s20, 2  ;;  %p125_p1 = scmp.ne.s32.totalorder %s620_s14, %s616_s13 }
   0x7   : > { %p126_p2 = scmp.eq.s32.totalorder %s433_s18, 1  ;;  %p131_p3 = scmp.ne.s32.totalorder %s616_s13, %s612_s12 }
   0x8   : > { %s810_s20 = smov (%p26_p0, %s25_s20), 0  ;;  %p132_p5 = scmp.eq.s32.totalorder %s434_s19, 1 }
   0x9   : > { %p697_p4 = por %p126_p2, %p125_p1  ;;  %s110_s23 = ssub.s32 %s628_s16, %s810_s20 }
   0xa   : > { %p439_p6 = scmp.ge.s32.totalorder %s632_s17, 1  ;;  %p113_p7 = scmp.eq.s32.totalorder %s110_s23, 0 }
   0xb   : > { %p704_p8 = por %p132_p5, %p131_p3  ;;  %p172_p9 = scmp.lt.s32.totalorder %s632_s17, 3 }
   0xc   : > { %s710_s25 = scalar_select %p113_p7, %s620_s14, %s115_s21  }
   0xd   : > { %p173_p10 = pnand %p439_p6, %p172_p9 }
   0xe   : > { %v219_v0 = vld [vmem:[%s799_s1] sm:$0xff] (!%p173_p10)  ;;  %v220_v1 = vld [vmem:[%s799_s1 + $0x8] sm:$0xff] (!%p173_p10)  ;;  %v221_v2 = vld [vmem:[%s799_s1 + $0x10] sm:$0xff] (!%p173_p10)  ;;  %s441_s5 = sshll.u32 (!%p173_p10), %s624_s15, 1  ;;  %vm234_vm0 = vcmask (!%p173_p10), 523264   ;;  %s200_s30 = sand.u32 (!%p173_p10), 1, %s616_s13  }
   0xf   : > { %176 = sbr.rel (%p173_p10) target bundleno = 263 (0x107), region = 32  ;;  %v481_v3 = vpack.c.bf16 (!%p173_p10), %v220_v1, %v219_v0  ;;  %v222_v4 = vld [vmem:[%s799_s1 + $0x18] sm:$0xff] (!%p173_p10)  ;;  %p204_p11 = scmp.lt.s32.totalorder (!%p173_p10), %s441_s5, 3  ;;  %v223_v6 = vld [vmem:[%s799_s1 + $0x20] sm:$0xff] (!%p173_p10)  ;;  %v224_v7 = vld [vmem:[%s799_s1 + $0x28] sm:$0xff] (!%p173_p10)  ;;  %vm316_vm1 = vcmask (!%p173_p10), 261120  }
  0x10   : > { %v485_v5 = vpack.c.bf16 (!%p173_p10), %v222_v4, %v221_v2  ;;  %v489_v8 = vpack.c.bf16 (!%p173_p10), %v224_v7, %v223_v6  ;;  %v225_v9 = vld [vmem:[%s799_s1 + $0x30] sm:$0xff] (!%p173_p10)  ;;  %v226_v10 = vld [vmem:[%s799_s1 + $0x38] sm:$0xff] (!%p173_p10)  ;;  %s440_s4 = sshll.u32 (!%p173_p10), %s200_s30, 4  ;;  %v443_v14 = vld [vmem:[%s800_s2] ss:$0 sm:$0xff] (!%p173_p10)  ;;  %s451_s9 = sshll.u32 (!%p173_p10), %s624_s15, 8 }
  0x11   : > { %482 = vmatprep.subr.bf16.mxu0 (!%p173_p10), %v481_v3  ;;  %v493_v12 = vpack.c.bf16 (!%p173_p10), %v226_v10, %v225_v9  ;;  %s202_s7 = scalar_lea.vmem (!%p173_p10), [#allocation2], %s440_s4  ;;  %s752_s19 = scalar_lea.sflag (!%p173_p10), [#allocation3], %s200_s30 }
  0x12   : > { %484 = vmatpush3.bf16.msra.mxu0 (!%p173_p10), %v481_v3  ;;  %s334_s8 = sshll.u32 (!%p173_p10), %s202_s7, 4  ;;  %s634_s21 = smov (!%p173_p10), [#allocation2]   ;;  %s745_s8 = int_to_ptr.vmem [resolvable:$true] %s334_s8 }
  0x13   : > { %486 = vmatprep.subr.bf16.mxu0 (!%p173_p10), %v485_v5  ;;  %s554_s15 = scalar_lea.vmem (!%p173_p10), %s745_s8, 256  ;;  %s558_s23 = sshll.u32 (!%p173_p10), %s634_s21, 4  ;;  %s559_s23 = int_to_ptr.vmem [resolvable:$false] %s558_s23 }
  0x14   : > { %p555_p12 = scmp.ne.s32.totalorder (!%p173_p10), %s745_s8, %s554_s15  ;;  %s560_s26 = scalar_lea.vmem (!%p173_p10), %s559_s23, 512 }
  0x15   : > { %p561_p1 = scmp.lt.s32.totalorder (!%p173_p10), %s745_s8, %s559_s23  ;;  %p562_p2 = scmp.lt.s32.totalorder (!%p173_p10), %s560_s26, %s554_s15 }
  0x16   : > { %s812_s5 = smov (!%p204_p11, %s441_s5), 3  ;;  %488 = vmatpush3.bf16.msra.mxu0 %v485_v5  ;;  %p556_p13 = pnand %p555_p12, %p697_p4 }
  0x17   : > { %s442_s18 = sshll.u32 %s812_s5, 3  ;;  %490 = vmatprep.subr.bf16.mxu0 %v489_v8  ;;  %p563_p3 = por %p562_p2, %p561_p1 }
  0x18   : > { %s207_s29 = scalar_lea.vmem %s798_s0, %s442_s18  ;;  %s750_s18 = scalar_lea.hbm %s801_s3, %s451_s9 }
  0x19   : > { %v217_v11 = vld [vmem:[%s207_s29] sm:$0xff]  ;;  %v218_v13 = vld [vmem:[%s207_s29 + $0x8] sm:$0xff]  ;;  %p557_p0 = pneg %p556_p13 }
  0x1a   : > { %478 = vmatprep.mubr.msk.f32.mxu0 %vm234_vm0, %v217_v11  ;;  %492 = vmatpush3.bf16.msra.mxu0 %v489_v8 }
  0x1b   : > { %494 = vmatprep.subr.bf16.mxu0 %v493_v12  ;;  %p564_p5 = pnand %p563_p3, %p557_p0 }
  0x1e   : > { %496 = vmatpush3.bf16.msra.mxu0 %v493_v12 }
  0x21   : > { %479 = vmatmul.mubr.msk.f32.vlgmr.msra.gmra.mrb[0].mxu0 %vm234_vm0, %v218_v13 }
  0xf4   : > { %v480_v15 = vpop.f32.mrb[0].mxu0 }
  0xf5   : > { %v313_v16 = vadd.f32 %v480_v15, %v443_v14  ;;  %v307_v17 = vpop.f32.mrb[1].mxu0 }
  0xf6   : > { %v308_v18 = vadd.f32 %v443_v14, %v307_v17 }
  0xf7   : > { %318 = vst.msk [vmem:[%s202_s7 + $0x8] sm:$0xff] %vm316_vm1, %v313_v16 }
  0xf8   : > { %317 = vst.msk [vmem:[%s202_s7] sm:$0xff] %vm316_vm1, %v308_v18 }
  0xf9   : > { %567 = shalt.err (!%p564_p5)
}
  0xfa   : > { %s568_s27 = scalar_lea.hbm %s750_s18, 256  ;;  %s572_s30 = scalar_lea.hbm %s801_s3, 512 }
  0xfb   : > { %p569_p6 = scmp.ne.s32.totalorder %s750_s18, %s568_s27  ;;  %p573_p10 = scmp.lt.u32.totalorder %s750_s18, %s801_s3 }
  0xfc   : > { %p574_p11 = scmp.lt.u32.totalorder %s572_s30, %s568_s27  ;;  %p576_p13 = scmp.lt.u32.totalorder %s568_s27, %s750_s18 }
  0xfd   : > { %p570_p7 = pnand %p569_p6, %p697_p4 }
  0xfe   : > { %p575_p12 = por %p574_p11, %p573_p10 }
  0xff   : > { %p571_p9 = pneg %p570_p7 }
 0x100   : > { %p577_p0 = por %p576_p13, %p575_p12 }
 0x102   : > { %p578_p1 = pnand %p577_p0, %p571_p9 }
 0x104   : > { %581 = shalt.err (!%p578_p1)
}
 0x105   : > { %s635_s6 = smov 128   ;;  %s636_s7 = smov 8  }
 0x106   : > { %497 = dma.vmem_to_hbm [thread:$0]  (%p697_p4), %s745_s8, 256, %s750_s18, %s752_s19, %s635_s6, %s635_s6, %s636_s7  }
 0x107 PF: > { %p503_p2 = scmp.ge.s32.totalorder %s632_s17, 2  ;;  %s349_s9 = sand.u32 1, %s612_s12  }
 0x108   : > { %s350_s10 = scalar_lea.sflag [#allocation3], %s349_s9 }
 0x109   : > { %p500_p3 = pnand %p503_p2, %p704_p8 }
 0x10b   : > { %607 = dma.done.wait (!%p500_p3), %s350_s10, 256  }
 0x10c   : > { %609 = vsyncadd (!%p500_p3), %s350_s10, 4294967040  ;;  %s16_s17 = sadd.s32 1, %s632_s17   ;;  %s804_s12 = smov %s616_s13 }
 0x10d   : > { %p13_p5 = scmp.ge.s32.totalorder %s16_s17, 4   ;;  %s805_s13 = smov %s620_s14 }
 0x10e   : > { %s806_s14 = smov %s710_s25  ;;  %s807_s15 = smov %s628_s16 }
 0x10f   : > { %s808_s16 = smov %s810_s20  ;;  %15 = sbr.rel (!%p13_p5) target bundleno = 4 (0x4), region = 73 }
 0x116   :  { %355 = vsyncpa [#allocation3], 1 }
 0x117   :  { %357 = vsyncpa [#allocation3 + $0x1], 1 }

</bundles_post_ra>
